<compile_context>
chip_gen: v7x
topology: tpu7x:2x2x1
jax: 0.10.0
libtpu: 0.0.40
codegen_flags: <defaults>
</compile_context>

<pallas_src>
import jax
import jax.numpy as jnp
from jax.experimental import pallas as pl
from jax.experimental.pallas import tpu as pltpu


def _conv3x3_s2_kernel(x_ref, w_ref, b_ref, o_ref):
    """One (batch, M-tile) grid cell of the im2col'd 3x3 / stride-2 / pad-1 conv.

    x_ref : (1, tm, 9*Cin)   im2col rows (one per output pixel of this tile)
    w_ref : (9*Cin, Cout)    flattened (kh, kw, Cin) -> Cout weights
    b_ref : (1, Cout)
    o_ref : (1, tm, Cout)
    """
    acc = jnp.dot(x_ref[0], w_ref[...], preferred_element_type=jnp.float32)
    acc = acc + b_ref[...].astype(jnp.float32)      # bias folded onto the f32 result
    o_ref[0] = acc.astype(o_ref.dtype)


def _vmem_capacity_bytes():
    """Physical per-core VMEM, with a conservative fallback (v7x = 64 MiB)."""
    try:
        cap = getattr(pltpu.get_tpu_info(), "vmem_capacity_bytes", None)
        if cap:
            return int(cap)
    except Exception:
        pass
    return 64 << 20


def _choose_m_tile(m_total, k9, cout, itemsize, budget, force_split):
    """Largest multiple-of-8 tile of the flattened Ho*Wo axis whose pipelined
    footprint (double-buffered in/out blocks + f32 matmul result) fits `budget`."""
    def step_bytes(t):
        return 2 * t * (k9 + cout) * itemsize + t * cout * 4

    tm = min(2048, -(-m_total // 8) * 8)           # target, rounded up to sublane multiple
    while tm > 8 and step_bytes(tm) > budget:
        tm -= 8
    if tm >= m_total:
        tm = m_total                               # full-extent block is always layout-legal
        if force_split and m_total >= 16:
            # batch == 1: give the second TensorCore (v7x) something to do
            tm = max(8, (-(-(m_total // 2) // 8)) * 8)
    return tm


def downsample_conv(x_nchw, w_oihw, b):
    """Equivalent of Downsample(channels, use_conv=True)(x) for an NCHW input."""
    n, c, h, w = x_nchw.shape
    cout, cin, kh_, kw_ = w_oihw.shape
    assert (kh_, kw_) == (3, 3) and cin == c
    ho, wo = (h + 1) // 2, (w + 1) // 2            # matches PyTorch k=3, s=2, p=1
    m_total = ho * wo
    k9 = 9 * cin
    itemsize = jnp.dtype(x_nchw.dtype).itemsize

    # ---- wrapper prep: layout-only im2col over the 3x3 / stride-2 window (XLA) ----
    # TODO(synk): replace with a manual-DMA kernel (memory_space=pl.ANY) reading padded
    #             NHWC directly to remove this extra HBM pass.
    x_nhwc = jnp.transpose(x_nchw, (0, 2, 3, 1))                   # (N,H,W,C)
    x_pad = jnp.pad(x_nhwc, ((0, 0), (1, 1), (1, 1), (0, 0)))      # (N,H+2,W+2,C)
    patches = [x_pad[:, kh:kh + 2 * ho:2, kw:kw + 2 * wo:2, :]
               for kh in range(3) for kw in range(3)]              # 9 x (N,Ho,Wo,C)
    x_cols = jnp.concatenate(patches, axis=-1).reshape(n, m_total, k9)

    w_flat = jnp.transpose(w_oihw, (2, 3, 1, 0)).reshape(k9, cout)  # (kh,kw,ci) rows
    b2 = b.reshape(1, cout)

    # ---- generation-aware tile / VMEM sizing ----
    vmem_cap = _vmem_capacity_bytes()
    block_budget = (20 << 20) if vmem_cap >= (100 << 20) else (8 << 20)
    tm = _choose_m_tile(m_total, k9, cout, itemsize, block_budget, force_split=(n == 1))
    m_steps = pl.cdiv(m_total, tm)

    w_bytes = (w_flat.size * jnp.dtype(w_flat.dtype).itemsize
               + b2.size * jnp.dtype(b2.dtype).itemsize)
    need = (2 * tm * (k9 + cout) * itemsize + tm * cout * 4
            + 2 * w_bytes + (2 << 20))
    vmem_limit = int(min(max(need, 32 << 20), vmem_cap - (4 << 20)))

    cost = pl.CostEstimate(
        flops=2 * n * m_total * k9 * cout,
        transcendentals=0,
        bytes_accessed=int((x_cols.size + w_flat.size + b2.size
                            + n * m_total * cout) * itemsize))

    out_flat = pl.pallas_call(
        _conv3x3_s2_kernel,
        out_shape=jax.ShapeDtypeStruct((n, m_total, cout), x_nchw.dtype),
        grid=(n, m_steps),
        in_specs=[
            pl.BlockSpec((1, tm, k9), lambda i, r: (i, r, 0)),
            pl.BlockSpec((k9, cout), lambda i, r: (0, 0)),
            pl.BlockSpec((1, cout), lambda i, r: (0, 0)),
        ],
        out_specs=pl.BlockSpec((1, tm, cout), lambda i, r: (i, r, 0)),
        compiler_params=pltpu.CompilerParams(
            dimension_semantics=("parallel", "parallel"),
            vmem_limit_bytes=vmem_limit),
        cost_estimate=cost,
    )(x_cols, w_flat, b2)

    out = out_flat.reshape(n, ho, wo, cout)        # free: contiguous
    return jnp.transpose(out, (0, 3, 1, 2))        # back to PyTorch's NCHW


def _ref_conv(x, weight, bias):
    x_nhwc = jnp.transpose(x, (0, 2, 3, 1))
    w_hwio = jnp.transpose(weight, (2, 3, 1, 0))
    r = jax.lax.conv_general_dilated(
        x_nhwc, w_hwio, window_strides=(2, 2), padding=((1, 1), (1, 1)),
        dimension_numbers=("NHWC", "HWIO", "NHWC")) + bias[None, None, None, :]
    return jnp.transpose(r, (0, 3, 1, 2))


if __name__ == "__main__":
    key = jax.random.PRNGKey(0)
    kx, kw, kb = jax.random.split(key, 3)

    N, C, H, W = 2, 4, 16, 16
    x = jax.random.normal(kx, (N, C, H, W), dtype=jnp.float32)

    # deterministic Conv2d-style init (uniform in +/- 1/sqrt(fan_in))
    fan_in = C * 3 * 3
    bound = 1.0 / (fan_in ** 0.5)
    weight = jax.random.uniform(kw, (C, C, 3, 3), jnp.float32, -bound, bound)  # OIHW
    bias = jax.random.uniform(kb, (C,), jnp.float32, -bound, bound)

    out = jax.block_until_ready(downsample_conv(x, weight, bias))
    ref = _ref_conv(x, weight, bias)
    assert out.shape == (N, C, H // 2, W // 2)
    assert jnp.allclose(out, ref, atol=1e-4, rtol=1e-4)

    # odd spatial dims: PyTorch Conv2d(k=3,s=2,p=1) gives ((H+1)//2, (W+1)//2)
    x_odd = jax.random.normal(kx, (1, C, 9, 11), dtype=jnp.float32)
    out_odd = jax.block_until_ready(downsample_conv(x_odd, weight, bias))
    ref_odd = _ref_conv(x_odd, weight, bias)
    assert out_odd.shape == (1, C, 5, 6)
    assert jnp.allclose(out_odd, ref_odd, atol=1e-4, rtol=1e-4)

    print("KERNEL_OK")
</pallas_src>

<mosaic_0001>
module attributes {stable_mosaic.version = 11 : i64} {
  func.func @_conv3x3_s2_kernel(%arg0: i32, %arg1: i32, %arg2: memref<1x64x36xf32, #tpu.memory_space<vmem>>, %arg3: memref<36x4xf32, #tpu.memory_space<vmem>>, %arg4: memref<1x4xf32, #tpu.memory_space<vmem>>, %arg5: memref<1x64x4xf32, #tpu.memory_space<vmem>>) attributes {dimension_semantics = [#tpu.dimension_semantics<parallel>, #tpu.dimension_semantics<parallel>], iteration_bounds = array<i64: 2, 1>, scalar_prefetch = 0 : i64, scratch_operands = 0 : i64, tpu.core_type = #tpu.core_type<tc>, window_params = [{transform_indices = @transform_0, window_bounds = array<i64: 1, 64, 36>}, {pipeline_mode = #tpu.pipeline_mode<synchronous>, transform_indices = @transform_1, window_bounds = array<i64: 36, 4>}, {pipeline_mode = #tpu.pipeline_mode<synchronous>, transform_indices = @transform_2, window_bounds = array<i64: 1, 4>}, {transform_indices = @transform_3, window_bounds = array<i64: 1, 64, 4>}]} {
    %c0 = arith.constant 0 : index
    %c0_0 = arith.constant 0 : index
    %c0_1 = arith.constant 0 : index
    %0 = vector.load %arg2[%c0, %c0_0, %c0_1] : memref<1x64x36xf32, #tpu.memory_space<vmem>>, vector<1x64x36xf32>
    %1 = vector.shape_cast %0 : vector<1x64x36xf32> to vector<64x36xf32>
    %c0_2 = arith.constant 0 : index
    %c0_3 = arith.constant 0 : index
    %2 = vector.load %arg3[%c0_2, %c0_3] : memref<36x4xf32, #tpu.memory_space<vmem>>, vector<36x4xf32>
    %cst = arith.constant dense<0.000000e+00> : vector<64x4xf32>
    %3 = tpu.matmul %1, %2, %cst {dimension_numbers = #tpu.dot_dimension_numbers<[1], [0], [0], [1], [0, 0, 1, 1], [], []>} : vector<64x36xf32>, vector<36x4xf32>, vector<64x4xf32> -> vector<64x4xf32>
    %c0_4 = arith.constant 0 : index
    %c0_5 = arith.constant 0 : index
    %4 = vector.load %arg4[%c0_4, %c0_5] : memref<1x4xf32, #tpu.memory_space<vmem>>, vector<1x4xf32>
    %5 = vector.broadcast %4 : vector<1x4xf32> to vector<64x4xf32>
    %6 = arith.addf %3, %5 : vector<64x4xf32>
    %c0_6 = arith.constant 0 : index
    %c0_7 = arith.constant 0 : index
    %c0_8 = arith.constant 0 : index
    %7 = vector.load %arg5[%c0_6, %c0_7, %c0_8] : memref<1x64x4xf32, #tpu.memory_space<vmem>>, vector<1x64x4xf32>
    %8 = vector.shape_cast %7 : vector<1x64x4xf32> to vector<64x4xf32>
    %9 = vector.shape_cast %6 : vector<64x4xf32> to vector<1x64x4xf32>
    tpu.vector_store %arg5[%c0_6, %c0_7, %c0_8], %9 {strides = array<i32>} : memref<1x64x4xf32, #tpu.memory_space<vmem>>, vector<1x64x4xf32>,
    return
  }
  func.func @transform_0(%arg0: i32, %arg1: i32) -> (i32, i32, i32) {
    %c0_i32 = arith.constant 0 : i32
    %c0_i32_0 = arith.constant 0 : i32
    return %arg0, %arg1, %c0_i32 : i32, i32, i32
  }
  func.func @transform_1(%arg0: i32, %arg1: i32) -> (i32, i32) {
    %c0_i32 = arith.constant 0 : i32
    %c0_i32_0 = arith.constant 0 : i32
    %c0_i32_1 = arith.constant 0 : i32
    return %c0_i32, %c0_i32_0 : i32, i32
  }
  func.func @transform_2(%arg0: i32, %arg1: i32) -> (i32, i32) {
    %c0_i32 = arith.constant 0 : i32
    %c0_i32_0 = arith.constant 0 : i32
    %c0_i32_1 = arith.constant 0 : i32
    return %c0_i32, %c0_i32_0 : i32, i32
  }
  func.func @transform_3(%arg0: i32, %arg1: i32) -> (i32, i32, i32) {
    %c0_i32 = arith.constant 0 : i32
    %c0_i32_0 = arith.constant 0 : i32
    return %arg0, %arg1, %c0_i32 : i32, i32, i32
  }
}

</mosaic_0001>

<bundles_post_ra>
// kernel: tpu_custom_call.1
= control target key start
LH: loop header
LB: loop body
LE: loop exit
PB: predicated region body
PF: predicated region fallthrough
CT: control target
= control target key end

     0   :  { %s600_s12 = smov 0   ;;  %s602_s13 = smov 0   ;;  %s674_s0 = inlined_call_operand.vmem [shape: f32[2,64,36], index: 0, kind: input, shape index: {}]   ;;  %s675_s1 = inlined_call_operand.vmem [shape: f32[36,4], index: 1, kind: input, shape index: {}]   ;;  %s676_s2 = inlined_call_operand.vmem [shape: f32[1,4], index: 2, kind: input, shape index: {}]   ;;  %s677_s3 = inlined_call_operand.vmem [shape: f32[2,64,4], index: 3, kind: output, shape index: {}]  }
   0x1   :  { %s604_s14 = smov 0  }
   0x2 LB: > { %s25_s15 = sadd.s32 1, %s574_s13  ;;  %p464_p0 = scmp.ge.s32.totalorder %s578_s14, 1  ;;  %s578_s14 = sphi %s604_s14, %s13_s14   ;;  %s574_s13 = sphi %s602_s13, %s679_s13   ;;  %s570_s12 = sphi %s600_s12, %s678_s12  }
   0x3   : > { %p27_p1 = scmp.ge.s32.totalorder %s25_s15, 2  ;;  %p158_p2 = scmp.lt.s32.totalorder %s578_s14, 3 }
   0x5   : > { %s681_s15 = smov (%p27_p1, %s25_s15), 0  ;;  %p159_p3 = pnand %p464_p0, %p158_p2 }
   0x6   : > { %v218_v0 = vld [vmem:[%s675_s1] sm:$0xff] (!%p159_p3)  ;;  %v219_v1 = vld [vmem:[%s675_s1 + $0x8] sm:$0xff] (!%p159_p3)  ;;  %v220_v2 = vld [vmem:[%s675_s1 + $0x10] sm:$0xff] (!%p159_p3)  ;;  %p191_p4 = scmp.lt.s32.totalorder (!%p159_p3), %s570_s12, 1  ;;  %vm230_vm0 = vcmask (!%p159_p3), 293888   ;;  %vm255_vm1 = vcmask (!%p159_p3), 1043456  }
   0x7   : > { %162 = sbr.rel (%p159_p3) target bundleno = 240 (0xf0), region = 32  ;;  %v518_v3 = vpack.c.bf16 (!%p159_p3), %v219_v1, %v218_v0  ;;  %v221_v4 = vld [vmem:[%s675_s1 + $0x18] sm:$0xff] (!%p159_p3)  ;;  %v222_v6 = vld [vmem:[%s675_s1 + $0x20] sm:$0xf] (!%p159_p3)  ;;  %vm364_vm2 = vcmask (!%p159_p3), 31744  }
   0x8   : > { %v522_v5 = vpack.c.bf16 (!%p159_p3), %v221_v4, %v220_v2  ;;  %v469_v15 = vld [vmem:[%s676_s2] ss:$0 sm:$0xff] (!%p159_p3) }
   0x9   : > { %519 = vmatprep.subr.bf16.mxu0 (!%p159_p3), %v518_v3  ;;  %526 = vmatprep.subr.bf16.mxu1 (!%p159_p3), %v518_v3 }
   0xa   : > { %521 = vmatpush3.bf16.msra.mxu0 (!%p159_p3), %v518_v3  ;;  %529 = vmatpush3.bf16.msra.mxu1 (!%p159_p3), %v518_v3 }
   0xb   : > { %523 = vmatprep.subr.bf16.mxu0 (!%p159_p3), %v522_v5  ;;  %527 = vmatprep.subr.bf16.mxu1 (!%p159_p3), %v522_v5 }
   0xe   : > { %s683_s12 = smov (!%p191_p4, %s570_s12), 1  ;;  %525 = vmatpush3.bf16.msra.mxu0 %v522_v5  ;;  %530 = vmatpush3.bf16.msra.mxu1 %v522_v5 }
   0xf   : > { %s481_s24 = sshll.u32 %s683_s12, 6  ;;  %504 = vmatprep.subr.msk.mxu0 %vm255_vm1, %v222_v6  ;;  %528 = vmatprep.subr.msk.mxu1 %vm255_vm1, %v222_v6 }
  0x10   : > { %s198_s27 = scalar_lea.vmem %s674_s0, %s481_s24  ;;  %s208_s7 = scalar_lea.vmem %s677_s3, %s481_s24 }
  0x11   : > { %v210_v7 = vld [vmem:[%s198_s27] sm:$0xff]  ;;  %v211_v9 = vld [vmem:[%s198_s27 + $0x8] sm:$0xff]  ;;  %v212_v11 = vld [vmem:[%s198_s27 + $0x10] sm:$0xff] }
  0x12   : > { %v214_v8 = vld [vmem:[%s198_s27 + $0x20] sm:$0xff]  ;;  %506 = vmatprep.mubr.msk.f32.mxu0 %vm230_vm0, %v210_v7  ;;  %v215_v10 = vld [vmem:[%s198_s27 + $0x28] sm:$0xff]  ;;  %v216_v12 = vld [vmem:[%s198_s27 + $0x30] sm:$0xff]  ;;  %505 = vmatpush3.msk.msra.mxu0 %vm255_vm1, %v222_v6 }
  0x13   : > { %512 = vmatprep.mubr.msk.f32.mxu1 %vm230_vm0, %v214_v8  ;;  %531 = vmatpush3.msk.msra.mxu1 %vm255_vm1, %v222_v6  ;;  %v213_v13 = vld [vmem:[%s198_s27 + $0x18] sm:$0xff] }
  0x14   : > { %507 = vmatmul.mubr.msk.f32.vlgmr.msra.gmra.mrb[0].mxu0 %vm230_vm0, %v211_v9  ;;  %513 = vmatmul.mubr.msk.f32.vlgmr.msra.gmra.mrb[0].mxu1 %vm230_vm0, %v215_v10  ;;  %v217_v14 = vld [vmem:[%s198_s27 + $0x38] sm:$0xff] }
  0x15   : > { %509 = vmatprep.mubr.msk.f32.mxu0 %vm230_vm0, %v212_v11  ;;  %515 = vmatprep.mubr.msk.f32.mxu1 %vm230_vm0, %v216_v12 }
  0x18   : > { %510 = vmatmul.mubr.msk.f32.gmra.mrb[2].mxu0 %vm230_vm0, %v213_v13  ;;  %516 = vmatmul.mubr.msk.f32.gmra.mrb[2].mxu1 %vm230_vm0, %v217_v14 }
  0xe7   : > { %v508_v16 = vpop.f32.mrb[0].mxu0  ;;  %v514_v17 = vpop.f32.mrb[0].mxu1 }
  0xe8   : > { %v331_v18 = vadd.f32 %v508_v16, %v469_v15  ;;  %v351_v19 = vadd.f32 %v514_v17, %v469_v15  ;;  %v325_v20 = vpop.f32.mrb[1].mxu0  ;;  %v345_v21 = vpop.f32.mrb[1].mxu1 }
  0xe9   : > { %v326_v22 = vadd.f32 %v469_v15, %v325_v20  ;;  %v346_v23 = vadd.f32 %v469_v15, %v345_v21 }
  0xea   : > { %366 = vst.msk [vmem:[%s208_s7 + $0x8] sm:$0xff] %vm364_vm2, %v331_v18  ;;  %370 = vst.msk [vmem:[%s208_s7 + $0x28] sm:$0xff] %vm364_vm2, %v351_v19 }
  0xeb   : > { %365 = vst.msk [vmem:[%s208_s7] sm:$0xff] %vm364_vm2, %v326_v22  ;;  %369 = vst.msk [vmem:[%s208_s7 + $0x20] sm:$0xff] %vm364_vm2, %v346_v23  ;;  %v511_v24 = vpop.f32.mrb[2].mxu0  ;;  %v517_v25 = vpop.f32.mrb[2].mxu1 }
  0xec   : > { %v341_v26 = vadd.f32 %v511_v24, %v469_v15  ;;  %v361_v27 = vadd.f32 %v517_v25, %v469_v15  ;;  %v335_v28 = vpop.f32.mrb[3].mxu0  ;;  %v355_v29 = vpop.f32.mrb[3].mxu1 }
  0xed   : > { %v336_v30 = vadd.f32 %v469_v15, %v335_v28  ;;  %v356_v31 = vadd.f32 %v469_v15, %v355_v29 }
  0xee   : > { %368 = vst.msk [vmem:[%s208_s7 + $0x18] sm:$0xff] %vm364_vm2, %v341_v26  ;;  %372 = vst.msk [vmem:[%s208_s7 + $0x38] sm:$0xff] %vm364_vm2, %v361_v27 }
  0xef   : > { %367 = vst.msk [vmem:[%s208_s7 + $0x10] sm:$0xff] %vm364_vm2, %v336_v30  ;;  %371 = vst.msk [vmem:[%s208_s7 + $0x30] sm:$0xff] %vm364_vm2, %v356_v31 }
  0xf0 PF: > { %s13_s14 = sadd.s32 1, %s578_s14   ;;  %s678_s12 = smov %s574_s13 }
  0xf1   : > { %p10_p5 = scmp.ge.s32.totalorder %s13_s14, 4   ;;  %s679_s13 = smov %s681_s15 }
  0xf3   :  { %12 = sbr.rel (!%p10_p5) target bundleno = 2 (0x2), region = 62 }

</bundles_post_ra>
